<compile_context>
chip_gen: v7x
topology: tpu7x:2x2x1
jax: 0.10.0
libtpu: 0.0.40
codegen_flags: <defaults>
</compile_context>

<pallas_src>
import functools

import jax
import jax.numpy as jnp
from jax.experimental import pallas as pl
from jax.experimental.pallas import tpu as pltpu


def _apply_act(x, act):
    if act == "tanh":
        return jnp.tanh(x)
    elif act == "sigmoid":
        return jax.nn.sigmoid(x)
    else:  # relu
        return jnp.maximum(x, 0.0)


def _combiner_kernel(h_ref, t_ref, wh_ref, wl_ref, b_ref, o_ref, *, act):
    # Two MXU matmuls with f32 accumulation, one broadcast bias add, activation.
    acc = jnp.dot(h_ref[...], wh_ref[...], preferred_element_type=jnp.float32)
    acc = acc + jnp.dot(t_ref[...], wl_ref[...], preferred_element_type=jnp.float32)
    acc = acc + b_ref[...]                      # (1, O) broadcasts over the tile
    o_ref[...] = _apply_act(acc, act).astype(o_ref.dtype)


def _round_up(x, m):
    return (x + m - 1) // m * m


def _device_budget():
    """Generation-specific VMEM budgets (bytes) and megacore step requirements."""
    try:
        kind = jax.devices()[0].device_kind.lower()
    except Exception:
        kind = ""
    if "v7" in kind:
        # v7x: 64 MiB VMEM per TC, 2 TCs/chip -> want >=2 grid steps, <=48 MiB scoped.
        return {"tile_budget": 40 << 20, "vmem_cap": 48 << 20, "min_steps": 2}
    if any(g in kind for g in ("v2", "v3", "v4", "v5", "v6")):
        # 128 MiB physical VMEM, single TensorCore -> bigger tiles, no step minimum.
        return {"tile_budget": 80 << 20, "vmem_cap": 96 << 20, "min_steps": 1}
    # Unknown device: conservative budget that is safe on every generation.
    return {"tile_budget": 40 << 20, "vmem_cap": 48 << 20, "min_steps": 1}


def _pick_tm(n_rows, *, align, budget_bytes, per_row_bytes, min_steps, override=None):
    """VMEM-budget-driven row tile. Big tiles amortize per-step overhead on this
    memory-bound op; only v7x asks for >=2 steps (and never below 1024 rows)."""
    if override is not None:
        return max(align, _round_up(min(override, _round_up(n_rows, align)), align))
    tm = budget_bytes // max(per_row_bytes, 1)
    tm = max(align, (tm // align) * align)
    tm = min(tm, 8192)                              # diminishing returns past here
    tm = min(tm, _round_up(n_rows, align))          # no point exceeding the work
    if min_steps > 1:
        steps = -(-n_rows // tm)
        if steps < min_steps and n_rows > min_steps * 1024:
            split = _round_up(-(-n_rows // min_steps), align)
            tm = max(1024, min(tm, split))
    return tm


def combiner_forward(head, tail, params, *, act="tanh", tm=None, out_dtype=None):
    """Pallas forward pass of Combiner.

    head, tail : (N, Din)  (f32 or bf16)
    params     : dict with wh, wl of shape (Din, O) (pre-transposed) and
                 bh, bl of shape (1, O).
    out_dtype  : output dtype. Defaults to head.dtype; pass jnp.bfloat16 when the
                 consumer tolerates it -- the output is the largest HBM stream here,
                 so halving it is a direct roofline win on all generations.
    """
    N, Din = head.shape
    O = params["wh"].shape[1]
    out_dtype = out_dtype or head.dtype

    in_sz = jnp.dtype(head.dtype).itemsize
    w_sz = jnp.dtype(params["wh"].dtype).itemsize
    out_sz = jnp.dtype(out_dtype).itemsize
    align = 16 if in_sz <= 2 else 8                 # bf16 packs 16 rows / sublane group

    cfg = _device_budget()

    # Per-row VMEM bytes of the streamed / per-tile data (includes the f32
    # matmul accumulator, which dominates once tm is large and out is bf16).
    per_row = (2 * (2 * Din * in_sz)    # head + tail tiles, double-buffered
               + 2 * (O * out_sz)       # output tile, double-buffered
               + O * 4)                 # f32 (tm, O) accumulator intermediate
    fixed = 2 * Din * O * w_sz + O * 4  # single-buffered weights + pre-summed bias

    tm = _pick_tm(N, align=align,
                  budget_bytes=cfg["tile_budget"] - fixed,
                  per_row_bytes=per_row,
                  min_steps=cfg["min_steps"],
                  override=tm)

    # Ragged N: no host-side pad/slice. cdiv grid; Pallas masks the writeback of
    # the final partial tile (rows are independent, OOB reads stay in OOB rows).
    grid = (pl.cdiv(N, tm),)

    # Pre-sum the two biases into a single (1, O) f32 vector (one-time O-length op).
    bias = (params["bh"].astype(jnp.float32)
            + params["bl"].astype(jnp.float32)).reshape(1, O)

    # Streamed row tiles / output (default double buffering) and grid-invariant,
    # single-buffered weight/bias blocks.
    # TODO(synk): if profiling on v5e shows exposed DMA, sweep pl.Buffered(3) on
    # row_spec/out_spec.
    row_spec = pl.BlockSpec((tm, Din), lambda i: (i, 0))
    w_spec = pl.BlockSpec((Din, O), lambda i: (0, 0), pipeline_mode=pl.Buffered(1))
    b_spec = pl.BlockSpec((1, O), lambda i: (0, 0), pipeline_mode=pl.Buffered(1))
    out_spec = pl.BlockSpec((tm, O), lambda i: (i, 0))

    # Scoped VMEM limit from the actual working set, capped per generation.
    working = tm * per_row + fixed
    vmem_limit = int(min(cfg["vmem_cap"], max(2 * working, 32 * 1024 * 1024)))

    return pl.pallas_call(
        functools.partial(_combiner_kernel, act=act),
        out_shape=jax.ShapeDtypeStruct((N, O), out_dtype),
        grid_spec=pltpu.PrefetchScalarGridSpec(
            num_scalar_prefetch=0,
            grid=grid,
            in_specs=[row_spec, row_spec, w_spec, w_spec, b_spec],
            out_specs=out_spec,
        ),
        compiler_params=pltpu.CompilerParams(
            dimension_semantics=("parallel",),
            vmem_limit_bytes=vmem_limit,
        ),
    )(head, tail, params["wh"], params["wl"], bias)


def init_linear_params(key, in_features, out_features):
    """Deterministic nn.Linear-style init: U(-1/sqrt(fan_in), 1/sqrt(fan_in))."""
    kw, kb = jax.random.split(key)
    bound = 1.0 / jnp.sqrt(in_features)
    # stored already transposed: (in, out)
    w = jax.random.uniform(kw, (in_features, out_features),
                           minval=-bound, maxval=bound, dtype=jnp.float32)
    b = jax.random.uniform(kb, (1, out_features),
                           minval=-bound, maxval=bound, dtype=jnp.float32)
    return w, b


def reference_forward(head, tail, params, act="tanh"):
    out = head @ params["wh"] + params["bh"] + tail @ params["wl"] + params["bl"]
    return _apply_act(out, act)


if __name__ == "__main__":
    input_size = 32
    output_size = 128          # multiple of 128 -> lane-dense, unmasked stores
    act = "tanh"

    key = jax.random.PRNGKey(0)
    k_h, k_t, k_wh, k_wl = jax.random.split(key, 4)

    wh, bh = init_linear_params(k_wh, input_size, output_size)
    wl, bl = init_linear_params(k_wl, input_size, output_size)
    params = dict(wh=wh, bh=bh, wl=wl, bl=bl)

    # --- small f32 case (single tile, exact fit) -------------------------------
    N = 16
    head = jax.random.normal(k_h, (N, input_size), dtype=jnp.float32)
    tail = jax.random.normal(k_t, (N, input_size), dtype=jnp.float32)

    out = jax.block_until_ready(combiner_forward(head, tail, params, act=act))
    ref = reference_forward(head, tail, params, act=act)
    assert out.shape == (N, output_size)
    assert jnp.allclose(out, ref, atol=1e-5, rtol=1e-5)

    # --- ragged N, forced small tile: exercises the masked partial final block --
    N2 = 200
    head2 = jax.random.normal(k_h, (N2, input_size), dtype=jnp.float32)
    tail2 = jax.random.normal(k_t, (N2, input_size), dtype=jnp.float32)
    out2 = jax.block_until_ready(
        combiner_forward(head2, tail2, params, act="relu", tm=64))
    ref2 = reference_forward(head2, tail2, params, act="relu")
    assert out2.shape == (N2, output_size)
    assert jnp.allclose(out2, ref2, atol=1e-5, rtol=1e-5)

    # --- multi-step grid + ragged last block -----------------------------------
    N3 = 1000
    head3 = jax.random.normal(k_h, (N3, input_size), dtype=jnp.float32)
    tail3 = jax.random.normal(k_t, (N3, input_size), dtype=jnp.float32)
    out3 = jax.block_until_ready(
        combiner_forward(head3, tail3, params, act="sigmoid", tm=256))
    ref3 = reference_forward(head3, tail3, params, act="sigmoid")
    assert out3.shape == (N3, output_size)
    assert jnp.allclose(out3, ref3, atol=1e-5, rtol=1e-5)

    # --- bf16 streams (f32 MXU accumulation), looser tolerance ------------------
    head_bf = head.astype(jnp.bfloat16)
    tail_bf = tail.astype(jnp.bfloat16)
    params_bf = {k: v.astype(jnp.bfloat16) for k, v in params.items()}
    out_bf = jax.block_until_ready(
        combiner_forward(head_bf, tail_bf, params_bf, act=act))
    assert out_bf.dtype == jnp.bfloat16
    assert jnp.allclose(out_bf.astype(jnp.float32), ref, atol=5e-2, rtol=5e-2)

    print("KERNEL_OK")
</pallas_src>

<mosaic_0001>
module attributes {stable_mosaic.version = 11 : i64} {
  func.func @_combiner_kernel(%arg0: i32, %arg1: memref<16x32xf32, #tpu.memory_space<vmem>>, %arg2: memref<16x32xf32, #tpu.memory_space<vmem>>, %arg3: memref<32x128xf32, #tpu.memory_space<vmem>>, %arg4: memref<32x128xf32, #tpu.memory_space<vmem>>, %arg5: memref<1x128xf32, #tpu.memory_space<vmem>>, %arg6: memref<16x128xf32, #tpu.memory_space<vmem>>) attributes {dimension_semantics = [#tpu.dimension_semantics<parallel>], iteration_bounds = array<i64: 1>, scalar_prefetch = 0 : i64, scratch_operands = 0 : i64, tpu.core_type = #tpu.core_type<tc>, window_params = [{transform_indices = @transform_0, window_bounds = array<i64: 16, 32>}, {transform_indices = @transform_1, window_bounds = array<i64: 16, 32>}, {pipeline_mode = #tpu.pipeline_mode<synchronous>, transform_indices = @transform_2, window_bounds = array<i64: 32, 128>}, {pipeline_mode = #tpu.pipeline_mode<synchronous>, transform_indices = @transform_3, window_bounds = array<i64: 32, 128>}, {pipeline_mode = #tpu.pipeline_mode<synchronous>, transform_indices = @transform_4, window_bounds = array<i64: 1, 128>}, {transform_indices = @transform_5, window_bounds = array<i64: 16, 128>}]} {
    %c0 = arith.constant 0 : index
    %c0_0 = arith.constant 0 : index
    %0 = vector.load %arg1[%c0, %c0_0] : memref<16x32xf32, #tpu.memory_space<vmem>>, vector<16x32xf32>
    %c0_1 = arith.constant 0 : index
    %c0_2 = arith.constant 0 : index
    %1 = vector.load %arg3[%c0_1, %c0_2] : memref<32x128xf32, #tpu.memory_space<vmem>>, vector<32x128xf32>
    %cst = arith.constant dense<0.000000e+00> : vector<16x128xf32>
    %2 = tpu.matmul %0, %1, %cst {dimension_numbers = #tpu.dot_dimension_numbers<[1], [0], [0], [1], [0, 0, 1, 1], [], []>} : vector<16x32xf32>, vector<32x128xf32>, vector<16x128xf32> -> vector<16x128xf32>
    %c0_3 = arith.constant 0 : index
    %c0_4 = arith.constant 0 : index
    %3 = vector.load %arg2[%c0_3, %c0_4] : memref<16x32xf32, #tpu.memory_space<vmem>>, vector<16x32xf32>
    %c0_5 = arith.constant 0 : index
    %c0_6 = arith.constant 0 : index
    %4 = vector.load %arg4[%c0_5, %c0_6] : memref<32x128xf32, #tpu.memory_space<vmem>>, vector<32x128xf32>
    %cst_7 = arith.constant dense<0.000000e+00> : vector<16x128xf32>
    %5 = tpu.matmul %3, %4, %cst_7 {dimension_numbers = #tpu.dot_dimension_numbers<[1], [0], [0], [1], [0, 0, 1, 1], [], []>} : vector<16x32xf32>, vector<32x128xf32>, vector<16x128xf32> -> vector<16x128xf32>
    %6 = arith.addf %2, %5 : vector<16x128xf32>
    %c0_8 = arith.constant 0 : index
    %c0_9 = arith.constant 0 : index
    %7 = vector.load %arg5[%c0_8, %c0_9] : memref<1x128xf32, #tpu.memory_space<vmem>>, vector<1x128xf32>
    %8 = vector.broadcast %7 : vector<1x128xf32> to vector<16x128xf32>
    %9 = arith.addf %6, %8 : vector<16x128xf32>
    %10 = math.tanh %9 : vector<16x128xf32>
    %c0_10 = arith.constant 0 : index
    %c0_11 = arith.constant 0 : index
    %11 = vector.load %arg6[%c0_10, %c0_11] : memref<16x128xf32, #tpu.memory_space<vmem>>, vector<16x128xf32>
    tpu.vector_store %arg6[%c0_10, %c0_11], %10 {strides = array<i32>} : memref<16x128xf32, #tpu.memory_space<vmem>>, vector<16x128xf32>,
    return
  }
  func.func @transform_0(%arg0: i32) -> (i32, i32) {
    %c0_i32 = arith.constant 0 : i32
    %c0_i32_0 = arith.constant 0 : i32
    return %arg0, %c0_i32 : i32, i32
  }
  func.func @transform_1(%arg0: i32) -> (i32, i32) {
    %c0_i32 = arith.constant 0 : i32
    %c0_i32_0 = arith.constant 0 : i32
    return %arg0, %c0_i32 : i32, i32
  }
  func.func @transform_2(%arg0: i32) -> (i32, i32) {
    %c0_i32 = arith.constant 0 : i32
    %c0_i32_0 = arith.constant 0 : i32
    %c0_i32_1 = arith.constant 0 : i32
    return %c0_i32, %c0_i32_0 : i32, i32
  }
  func.func @transform_3(%arg0: i32) -> (i32, i32) {
    %c0_i32 = arith.constant 0 : i32
    %c0_i32_0 = arith.constant 0 : i32
    %c0_i32_1 = arith.constant 0 : i32
    return %c0_i32, %c0_i32_0 : i32, i32
  }
  func.func @transform_4(%arg0: i32) -> (i32, i32) {
    %c0_i32 = arith.constant 0 : i32
    %c0_i32_0 = arith.constant 0 : i32
    %c0_i32_1 = arith.constant 0 : i32
    return %c0_i32, %c0_i32_0 : i32, i32
  }
  func.func @transform_5(%arg0: i32) -> (i32, i32) {
    %c0_i32 = arith.constant 0 : i32
    %c0_i32_0 = arith.constant 0 : i32
    return %arg0, %c0_i32 : i32, i32
  }
}

</mosaic_0001>

<bundles_post_ra>
// kernel: tpu_custom_call.1
= control target key start
LH: loop header
LB: loop body
LE: loop exit
PB: predicated region body
PF: predicated region fallthrough
CT: control target
= control target key end

     0   :  { %10 = vsyncpa [#allocation3], 0  ;;  %s602_s0 = inlined_call_operand.hbm [shape: f32[16,32], index: 0, kind: input, shape index: {}]   ;;  %s603_s1 = inlined_call_operand.hbm [shape: f32[16,32], index: 1, kind: input, shape index: {}]   ;;  %s604_s2 = inlined_call_operand.hbm [shape: f32[32,128], index: 2, kind: input, shape index: {}]   ;;  %s605_s3 = inlined_call_operand.hbm [shape: f32[32,128], index: 3, kind: input, shape index: {}]   ;;  %s606_s4 = inlined_call_operand.vmem [shape: f32[1,128], index: 4, kind: input, shape index: {}]   ;;  %s607_s5 = inlined_call_operand.hbm [shape: f32[16,128], index: 5, kind: output, shape index: {}]  }
   0x1   :  { %11 = vsyncpa [#allocation6], 0 }
   0x2   :  { %12 = vsyncpa [#allocation9], 0 }
   0x3   :  { %13 = vsyncpa [#allocation4], 0  ;;  %s469_s18 = smov [#allocation5]   ;;  %s470_s20 = smov [#allocation2]  }
   0x4   :  { %s31_s19 = sshll.u32 %s469_s18, 4  ;;  %s19_s21 = sshll.u32 %s470_s20, 4  ;;  %s32_s19 = int_to_ptr.vmem [resolvable:$true] %s31_s19  ;;  %s506_s21 = int_to_ptr.vmem [resolvable:$true] %s19_s21 }
   0x5   :  { %s351_s24 = scalar_lea.hbm %s603_s1, 256 }
   0x6   :  { %p352_p0 = scmp.ne.s32.totalorder %s603_s1, %s351_s24  ;;  %p355_p1 = scmp.lt.u32.totalorder %s351_s24, %s603_s1 }
   0x8   :  { %p357_p2 = pnand %p355_p1, %p352_p0 }
   0xa   :  { %360 = shalt.err (!%p357_p2)
}
   0xb   :  { %s361_s29 = scalar_lea.vmem %s32_s19, 256  ;;  %p366_p4 = scmp.lt.s32.totalorder %s32_s19, %s32_s19 }
   0xc   :  { %p362_p3 = scmp.ne.s32.totalorder %s32_s19, %s361_s29  ;;  %p367_p5 = scmp.lt.s32.totalorder %s361_s29, %s361_s29 }
   0xe   :  { %p368_p6 = por %p367_p5, %p366_p4 }
  0x10   :  { %p369_p7 = pnand %p368_p6, %p362_p3 }
  0x12   :  { %372 = shalt.err (!%p369_p7)
}
  0x13   :  { %s471_s30 = smov 128   ;;  %s472_s6 = smov 8  }
  0x14   :  { %37 = dma.hbm_to_vmem [thread:$0]  %s603_s1, 256, %s32_s19, [#allocation6], %s471_s30, %s471_s30, %s472_s6  }
  0x15   :  { %s373_s11 = scalar_lea.hbm %s602_s0, 256 }
  0x16   :  { %p374_p8 = scmp.ne.s32.totalorder %s602_s0, %s373_s11  ;;  %p377_p9 = scmp.lt.u32.totalorder %s373_s11, %s602_s0 }
  0x18   :  { %p379_p10 = pnand %p377_p9, %p374_p8 }
  0x1a   :  { %382 = shalt.err (!%p379_p10)
}
  0x1b   :  { %s383_s16 = scalar_lea.vmem %s506_s21, 256  ;;  %p388_p12 = scmp.lt.s32.totalorder %s506_s21, %s506_s21 }
  0x1c   :  { %p384_p11 = scmp.ne.s32.totalorder %s506_s21, %s383_s16  ;;  %p389_p13 = scmp.lt.s32.totalorder %s383_s16, %s383_s16 }
  0x1e   :  { %p390_p0 = por %p389_p13, %p388_p12 }
  0x20   :  { %p391_p1 = pnand %p390_p0, %p384_p11 }
  0x22   :  { %394 = shalt.err (!%p391_p1)
}
  0x23   :  { %25 = dma.hbm_to_vmem [thread:$0]  %s602_s0, 256, %s506_s21, [#allocation3], %s471_s30, %s471_s30, %s472_s6  }
  0x24   :  { %s473_s18 = smov [#allocation7]   ;;  %s474_s20 = smov [#allocation8]  }
  0x25   :  { %s43_s19 = sshll.u32 %s473_s18, 4  ;;  %s55_s22 = sshll.u32 %s474_s20, 4  ;;  %s44_s19 = int_to_ptr.vmem [resolvable:$true] %s43_s19  ;;  %s543_s22 = int_to_ptr.vmem [resolvable:$true] %s55_s22 }
  0x26   :  { %s395_s25 = scalar_lea.hbm %s604_s2, 512 }
  0x27   :  { %p396_p2 = scmp.ne.s32.totalorder %s604_s2, %s395_s25  ;;  %p399_p3 = scmp.lt.u32.totalorder %s395_s25, %s604_s2 }
  0x29   :  { %p401_p4 = pnand %p399_p3, %p396_p2 }
  0x2b   :  { %404 = shalt.err (!%p401_p4)
}
  0x2c   :  { %s405_s0 = scalar_lea.vmem %s44_s19, 512  ;;  %p410_p6 = scmp.lt.s32.totalorder %s44_s19, %s44_s19 }
  0x2d   :  { %p406_p5 = scmp.ne.s32.totalorder %s44_s19, %s405_s0  ;;  %p411_p7 = scmp.lt.s32.totalorder %s405_s0, %s405_s0 }
  0x2f   :  { %p412_p8 = por %p411_p7, %p410_p6 }
  0x31   :  { %p413_p9 = pnand %p412_p8, %p406_p5 }
  0x33   :  { %416 = shalt.err (!%p413_p9)
}
  0x34   :  { %49 = dma.hbm_to_vmem [thread:$0]  %s604_s2, 512, %s44_s19, [#allocation6], %s471_s30, %s471_s30, %s472_s6  }
  0x35   :  { %s417_s10 = scalar_lea.hbm %s605_s3, 512 }
  0x36   :  { %p418_p10 = scmp.ne.s32.totalorder %s605_s3, %s417_s10  ;;  %p421_p11 = scmp.lt.u32.totalorder %s417_s10, %s605_s3 }
  0x38   :  { %p423_p12 = pnand %p421_p11, %p418_p10 }
  0x3a   :  { %426 = shalt.err (!%p423_p12)
}
  0x3b   :  { %s427_s15 = scalar_lea.vmem %s543_s22, 512  ;;  %p432_p0 = scmp.lt.s32.totalorder %s543_s22, %s543_s22 }
  0x3c   :  { %p428_p13 = scmp.ne.s32.totalorder %s543_s22, %s427_s15  ;;  %p433_p1 = scmp.lt.s32.totalorder %s427_s15, %s427_s15 }
  0x3e   :  { %p434_p2 = por %p433_p1, %p432_p0 }
  0x40   :  { %p435_p3 = pnand %p434_p2, %p428_p13 }
  0x42   :  { %438 = shalt.err (!%p435_p3)
}
  0x43   :  { %61 = dma.hbm_to_vmem [thread:$0]  %s605_s3, 512, %s543_s22, [#allocation9], %s471_s30, %s471_s30, %s472_s6  }
  0x44   :  { %461 = dma.done.wait [#allocation3], 256  }
  0x45   :  { %462 = vsyncadd [#allocation3], 4294967040 }
  0x46   :  { %463 = dma.done.wait [#allocation6], 768  }
  0x47   :  { %464 = vsyncadd [#allocation6], 4294966528 }
  0x48   :  { %465 = dma.done.wait [#allocation9], 512  }
  0x49   :  { %466 = vsyncadd [#allocation9], 4294966784  ;;  %v84_v0 = vld [vmem:[#allocation8] sm:$0xff]  ;;  %v85_v1 = vld [vmem:[#allocation8 + $0x8] sm:$0xff]  ;;  %vm88_vm0 = vcmask 261120   ;;  %s475_s17 = smov [#allocation10]  }
  0x4a   :  { %v78_v2 = vld [vmem:[#allocation7] sm:$0xff]  ;;  %v322_v3 = vpack.c.bf16 %v85_v1, %v84_v0  ;;  %v79_v4 = vld [vmem:[#allocation7 + $0x8] sm:$0xff]  ;;  %v86_v5 = vld [vmem:[#allocation8 + $0x10] sm:$0xff]  ;;  %s269_s18 = sshll.u32 %s475_s17, 4  ;;  %s270_s18 = int_to_ptr.vmem [resolvable:$true] %s269_s18 }
  0x4b   :  { %v87_v6 = vld [vmem:[#allocation8 + $0x18] sm:$0xff]  ;;  %v330_v7 = vpack.c.bf16 %v79_v4, %v78_v2  ;;  %v80_v9 = vld [vmem:[#allocation7 + $0x10] sm:$0xff]  ;;  %v76_v13 = vld [vmem:[#allocation2] sm:$0xff]  ;;  %s439_s19 = scalar_lea.vmem %s270_s18, 256  ;;  %p444_p5 = scmp.lt.s32.totalorder %s270_s18, %s270_s18 }
  0x4c   :  { %v326_v8 = vpack.c.bf16 %v87_v6, %v86_v5  ;;  %v81_v10 = vld [vmem:[#allocation7 + $0x18] sm:$0xff]  ;;  %v82_v11 = vld [vmem:[#allocation5] sm:$0xff]  ;;  %323 = vmatprep.subr.bf16.mxu1 %v322_v3  ;;  %319 = vmatprep.mubr.msk.f32.mxu0 %vm88_vm0, %v76_v13  ;;  %v77_v15 = vld [vmem:[#allocation2 + $0x8] sm:$0xff]  ;;  %p440_p4 = scmp.ne.s32.totalorder %s270_s18, %s439_s19  ;;  %p445_p6 = scmp.lt.s32.totalorder %s439_s19, %s439_s19 }
  0x4d   :  { %v334_v12 = vpack.c.bf16 %v81_v10, %v80_v9  ;;  %308 = vmatprep.mubr.msk.f32.mxu1 %vm88_vm0, %v82_v11  ;;  %331 = vmatprep.subr.bf16.mxu0 %v330_v7  ;;  %v83_v14 = vld [vmem:[#allocation5 + $0x8] sm:$0xff]  ;;  %v287_v18 = vld [vmem:[%s606_s4] ss:$0 sm:$0xff] }
  0x4e   :  { %325 = vmatpush3.bf16.msra.mxu1 %v322_v3  ;;  %333 = vmatpush3.bf16.msra.mxu0 %v330_v7  ;;  %p446_p7 = por %p445_p6, %p444_p5 }
  0x4f   :  { %327 = vmatprep.subr.bf16.mxu1 %v326_v8  ;;  %335 = vmatprep.subr.bf16.mxu0 %v334_v12 }
  0x50   :  { %p447_p8 = pnand %p446_p7, %p440_p4 }
  0x52   :  { %329 = vmatpush3.bf16.msra.mxu1 %v326_v8  ;;  %337 = vmatpush3.bf16.msra.mxu0 %v334_v12 }
  0x55   :  { %309 = vmatmul.mubr.msk.f32.vlgmr.msra.gmra.mrb[0].mxu1 %vm88_vm0, %v83_v14  ;;  %320 = vmatmul.mubr.msk.f32.vlgmr.msra.gmra.mrb[0].mxu0 %vm88_vm0, %v77_v15 }
 0x128   :  { %v310_v16 = vpop.f32.mrb[0].mxu1  ;;  %v321_v17 = vpop.f32.mrb[0].mxu0 }
 0x129   :  { %v161_v19 = vpop.f32.mrb[1].mxu1  ;;  %v248_v20 = vadd.f32 %v321_v17, %v310_v16  ;;  %v242_v21 = vpop.f32.mrb[1].mxu0 }
 0x12a   :  { %v243_v22 = vadd.f32 %v242_v21, %v161_v19 }
 0x12b   :  { %v259_v23 = vadd.f32 %v287_v18, %v248_v20 }
 0x12c   :  { %v258_v24 = vadd.f32 %v287_v18, %v243_v22 }
 0x12d   :  { %347 = vtanh.f32 %v259_v23 }
 0x12e   :  { %349 = vtanh.f32 %v258_v24 }
 0x137   :  { %v348_v25 = vpop.eup %347 }
 0x138   :  { %v350_v26 = vpop.eup %349  ;;  %263 = vst [vmem:[#allocation10 + $0x8] sm:$0xff] %v348_v25 }
 0x139   :  { %262 = vst [vmem:[#allocation10] sm:$0xff] %v350_v26 }
 0x13a   :  { %450 = shalt.err (!%p447_p8)
}
 0x13b   :  { %s451_s22 = scalar_lea.hbm %s607_s5, 256 }
 0x13c   :  { %p452_p9 = scmp.ne.s32.totalorder %s607_s5, %s451_s22  ;;  %p455_p10 = scmp.lt.u32.totalorder %s451_s22, %s607_s5 }
 0x13e   :  { %p457_p11 = pnand %p455_p10, %p452_p9 }
 0x140   :  { %460 = shalt.err (!%p457_p11)
}
 0x141   :  { %275 = dma.vmem_to_hbm [thread:$0]  %s270_s18, 256, %s607_s5, [#allocation4], %s471_s30, %s471_s30, %s472_s6  }
 0x142   :  { %467 = dma.done.wait [#allocation4], 256  }
 0x143   :  { %468 = vsyncadd [#allocation4], 4294967040 }
 0x144   :  { %279 = vsyncpa [#allocation3], 1 }
 0x145   :  { %280 = vsyncpa [#allocation6], 1 }
 0x146   :  { %281 = vsyncpa [#allocation9], 1 }
 0x147   :  { %282 = vsyncpa [#allocation4], 1 }

</bundles_post_ra>
